<compile_context>
chip_gen: v6e
topology: v6e:2x2x1
jax: 0.10.0
libtpu: 0.0.40
codegen_flags: <defaults>
</compile_context>

<pallas_src>
import functools

import jax
import jax.numpy as jnp
from jax import lax
from jax.experimental import pallas as pl
from jax.experimental.pallas import tpu as pltpu


def _round_up(x, m):
    return (x + m - 1) // m * m


# ----------------------------------------------------------------------------
# Kernel 1: serial recurrence   h_t = tanh(xw_t + h_{t-1} @ Whh^T)
# (bias bh is pre-folded into xw_t by the wrapper).
# grid=(num_chunks,), inner unrolled fori_loop of Tc steps per chunk.
# ----------------------------------------------------------------------------
def _recurrence_kernel(xw_ref,      # (Tc, Np, Hp)  Wxh^T[token] + bh, per step
                       h0_ref,      # (Np, Hp)      initial hidden state
                       whh_t_ref,   # (Hp, Hp)      Whh^T (zero-padded)
                       h_all_ref,   # out: (Tc, Np, Hp) hidden state per step
                       h_scratch,   # VMEM (Np, Hp) hidden state carried across chunks
                       *, chunk):
    c = pl.program_id(0)

    @pl.when(c == 0)
    def _():
        h_scratch[...] = h0_ref[...]

    whh = whh_t_ref[...]            # hoisted: loop-invariant load

    def step(s, h):
        h_new = jnp.tanh(xw_ref[s]
                         + jnp.dot(h, whh, preferred_element_type=jnp.float32))
        h_all_ref[s] = h_new        # padded H columns stay exactly 0
        return h_new

    h_last = lax.fori_loop(0, chunk, step, h_scratch[...], unroll=True)
    h_scratch[...] = h_last


@functools.lru_cache(maxsize=None)
def _build_recurrence_call(num_chunks, chunk, Np, Hp):
    kernel = functools.partial(_recurrence_kernel, chunk=chunk)
    const2 = lambda c: (0, 0)       # weights / h0 stay VMEM-resident
    grid_spec = pltpu.PrefetchScalarGridSpec(
        num_scalar_prefetch=0,
        grid=(num_chunks,),
        in_specs=[
            pl.BlockSpec((chunk, Np, Hp), lambda c: (c, 0, 0)),   # xw chunk (pipelined)
            pl.BlockSpec((Np, Hp), const2),                       # h0
            pl.BlockSpec((Hp, Hp), const2),                       # Whh^T
        ],
        out_specs=pl.BlockSpec((chunk, Np, Hp), lambda c: (c, 0, 0)),
        scratch_shapes=[pltpu.VMEM((Np, Hp), jnp.float32)],
    )
    return pl.pallas_call(
        kernel,
        grid_spec=grid_spec,
        out_shape=jax.ShapeDtypeStruct((num_chunks * chunk, Np, Hp), jnp.float32),
        compiler_params=pltpu.CompilerParams(
            # True recurrence -> sequential grid axis.
            dimension_semantics=("arbitrary",)),
    )


# ----------------------------------------------------------------------------
# Kernel 2: batched output projection  logits = H @ Why^T + by  (+ softmax)
# over ALL T*N rows at once; grid axis is parallel (v7x: 2 TensorCores).
# ----------------------------------------------------------------------------
def _projection_kernel(h_ref,       # (Mb, Hp)
                       why_t_ref,   # (Hp, Vp)
                       by_ref,      # (1, Vp)
                       out_ref,     # (Mb, Vp)
                       *, vocab_size, return_probs):
    logits = (jnp.dot(h_ref[...], why_t_ref[...],
                      preferred_element_type=jnp.float32) + by_ref[...])
    if return_probs:
        # Mask padded vocab lanes so they contribute 0 to the softmax.
        lane = lax.broadcasted_iota(jnp.int32, logits.shape, 1)
        logits = jnp.where(lane < vocab_size, logits, -jnp.inf)
        m = jnp.max(logits, axis=-1, keepdims=True)
        e = jnp.exp(logits - m)
        logits = e / jnp.sum(e, axis=-1, keepdims=True)   # exact divide (sampling-safe)
    out_ref[...] = logits


@functools.lru_cache(maxsize=None)
def _build_projection_call(num_blocks, Mb, Hp, Vp, V, return_probs):
    kernel = functools.partial(_projection_kernel, vocab_size=V,
                               return_probs=return_probs)
    grid_spec = pltpu.PrefetchScalarGridSpec(
        num_scalar_prefetch=0,
        grid=(num_blocks,),
        in_specs=[
            pl.BlockSpec((Mb, Hp), lambda i: (i, 0)),   # hidden-state rows
            pl.BlockSpec((Hp, Vp), lambda i: (0, 0)),   # Why^T (resident)
            pl.BlockSpec((1, Vp), lambda i: (0, 0)),    # by row
        ],
        out_specs=pl.BlockSpec((Mb, Vp), lambda i: (i, 0)),
    )
    return pl.pallas_call(
        kernel,
        grid_spec=grid_spec,
        out_shape=jax.ShapeDtypeStruct((num_blocks * Mb, Vp), jnp.float32),
        compiler_params=pltpu.CompilerParams(
            dimension_semantics=("parallel",)),
    )


# ----------------------------------------------------------------------------
# Parameters (PyTorch layout) + one-time kernel-facing preparation
# ----------------------------------------------------------------------------
def init_params(key, hidden_size, vocab_size):
    k1, k2, k3 = jax.random.split(key, 3)
    return {
        "Wxh": jax.random.normal(k1, (hidden_size, vocab_size), jnp.float32) * 0.01,
        "Whh": jax.random.normal(k2, (hidden_size, hidden_size), jnp.float32) * 0.01,
        "Why": jax.random.normal(k3, (vocab_size, hidden_size), jnp.float32) * 0.01,
        "bh": jnp.zeros((hidden_size, 1), jnp.float32),
        "by": jnp.zeros((vocab_size, 1), jnp.float32),
    }


def prepare_kernel_params(params):
    """Transpose + lane-pad the weights ONCE (not per forward call)."""
    Wxh, Whh, Why, bh, by = (params["Wxh"], params["Whh"], params["Why"],
                             params["bh"], params["by"])
    H, V = Wxh.shape
    Hp = _round_up(max(H, 128), 128)
    Vp = _round_up(max(V, 128), 128)
    wxh_t = jnp.zeros((V, Hp), jnp.float32).at[:, :H].set(Wxh.T)
    whh_t = jnp.zeros((Hp, Hp), jnp.float32).at[:H, :H].set(Whh.T)
    why_t = jnp.zeros((Hp, Vp), jnp.float32).at[:H, :V].set(Why.T)
    bh_row = jnp.zeros((1, Hp), jnp.float32).at[0, :H].set(bh[:, 0])
    by_row = jnp.zeros((1, Vp), jnp.float32).at[0, :V].set(by[:, 0])
    return {"H": H, "V": V, "Hp": Hp, "Vp": Vp,
            "wxh_t": wxh_t, "whh_t": whh_t, "why_t": why_t,
            "bh_row": bh_row, "by_row": by_row}


# ----------------------------------------------------------------------------
# Wrappers
# ----------------------------------------------------------------------------
def rnn_forward_sequence(kparams, token_seq, hidden_state, return_probs=False):
    """Run T RNN steps: fused recurrence kernel + batched projection kernel.

    token_seq: (T, N) int token ids; hidden_state: (N, H, 1) float32.
    Returns (logits_or_probs (T, N, V, 1), final_hidden (N, H, 1))."""
    token_seq = jnp.asarray(token_seq).astype(jnp.int32)
    T, N = token_seq.shape
    H, V, Hp, Vp = kparams["H"], kparams["V"], kparams["Hp"], kparams["Vp"]
    Np = _round_up(max(N, 8), 8)

    # Time-chunking: amortize per-grid-step overhead over Tc inner steps.
    Tc = T if T <= 32 else 32
    T_pad = _round_up(T, Tc)
    num_chunks = T_pad // Tc

    # Embedding lookup (one-hot matmul == row gather of Wxh^T) for ALL steps,
    # computed off the recurrent critical path; fold bh in here too.
    xw = jnp.take(kparams["wxh_t"], token_seq, axis=0) + kparams["bh_row"]   # (T, N, Hp)
    xw_p = jnp.zeros((T_pad, Np, Hp), jnp.float32).at[:T, :N, :].set(xw)
    h0_p = jnp.zeros((Np, Hp), jnp.float32).at[:N, :H].set(hidden_state[:, :, 0])

    rec = _build_recurrence_call(num_chunks, Tc, Np, Hp)
    h_all = rec(xw_p, h0_p, kparams["whh_t"])          # (T_pad, Np, Hp)
    h_final = h_all[T - 1, :N, :H, None]               # (N, H, 1)

    # Batched output projection (+ optional softmax) over all T*Np rows.
    M = T_pad * Np
    Mb = M if M <= 512 else 512
    M_pad = _round_up(M, Mb)
    h_flat = h_all.reshape(M, Hp)
    if M_pad != M:
        h_flat = jnp.zeros((M_pad, Hp), jnp.float32).at[:M, :].set(h_flat)
    proj = _build_projection_call(M_pad // Mb, Mb, Hp, Vp, V, bool(return_probs))
    logits_flat = proj(h_flat, kparams["why_t"], kparams["by_row"])   # (M_pad, Vp)
    logits = logits_flat[:M].reshape(T_pad, Np, Vp)[:T, :N, :V, None]  # (T, N, V, 1)
    return logits, h_final


def rnn_forward(kparams, inputs, hidden_state, return_probs=False):
    """Single-step forward matching the PyTorch module.

    inputs: (batch=1, N, 1) int token ids; hidden_state: (N, H, 1) float32.
    Returns (logits_or_probs (N, V, 1), new_hidden_state (N, H, 1))."""
    inputs = jnp.asarray(inputs)
    token_ids = inputs[0, :, 0].astype(jnp.int32)            # (N,)
    logits_seq, h_new = rnn_forward_sequence(
        kparams, token_ids[None, :], hidden_state, return_probs)
    return logits_seq[0], h_new


# ----------------------------------------------------------------------------
# Pure-JAX reference (mirrors the PyTorch math) for correctness checks
# ----------------------------------------------------------------------------
def _reference_step(params, token_ids, hidden_state, return_probs=False):
    V = params["Wxh"].shape[1]
    hp = jax.lax.Precision.HIGHEST
    x = jax.nn.one_hot(token_ids, V, dtype=jnp.float32)[:, :, None]   # (N, V, 1)
    first = jnp.einsum("hv,nvo->nho", params["Wxh"], x, precision=hp)
    second = jnp.einsum("hg,ngo->nho", params["Whh"], hidden_state, precision=hp)
    h_new = jnp.tanh(first + second + params["bh"][None])
    logits = jnp.einsum("vh,nho->nvo", params["Why"], h_new, precision=hp) + params["by"][None]
    if return_probs:
        logits = jax.nn.softmax(logits, axis=1)
    return logits, h_new


def _reference_sequence(params, token_seq, hidden_state, return_probs=False):
    outs = []
    h = hidden_state
    for t in range(token_seq.shape[0]):
        o, h = _reference_step(params, token_seq[t], h, return_probs)
        outs.append(o)
    return jnp.stack(outs, axis=0), h


# TODO(synk): sample_data (host-driven sampling loop with np.random.choice,
# char dict lookups and file writes) is host-side control flow, not a kernel.

if __name__ == "__main__":
    hidden_size = 32
    vocab_size = 16
    num_sequences = 8
    seq_len = 8
    batch_size = 1

    key = jax.random.PRNGKey(0)
    pkey, ikey = jax.random.split(key)
    params = init_params(pkey, hidden_size, vocab_size)
    kparams = prepare_kernel_params(params)       # one-time transpose + pad

    token_seq = jax.random.randint(ikey, (seq_len, num_sequences), 0, vocab_size)
    hidden_state = jnp.zeros((num_sequences, hidden_size, 1), jnp.float32)

    # --- single-step forward (module semantics) ---
    inputs = token_seq[0][None, :, None]          # (1, N, 1)
    logits, h_new = rnn_forward(kparams, inputs, hidden_state, return_probs=False)
    probs, _ = rnn_forward(kparams, inputs, hidden_state, return_probs=True)
    jax.block_until_ready((logits, h_new, probs))

    ref_logits, ref_h = _reference_step(params, token_seq[0], hidden_state)
    ref_probs, _ = _reference_step(params, token_seq[0], hidden_state, return_probs=True)
    assert logits.shape == (num_sequences, vocab_size, 1)
    assert h_new.shape == (num_sequences, hidden_size, 1)
    assert jnp.allclose(logits, ref_logits, atol=1e-5)
    assert jnp.allclose(h_new, ref_h, atol=1e-5)
    assert jnp.allclose(probs, ref_probs, atol=1e-3)

    # --- fused multi-step sequence (chunked recurrence + batched projection) ---
    seq_logits, seq_h = rnn_forward_sequence(kparams, token_seq, hidden_state)
    jax.block_until_ready((seq_logits, seq_h))
    ref_seq_logits, ref_seq_h = _reference_sequence(params, token_seq, hidden_state)
    assert seq_logits.shape == (seq_len, num_sequences, vocab_size, 1)
    assert jnp.allclose(seq_logits, ref_seq_logits, atol=1e-5)
    assert jnp.allclose(seq_h, ref_seq_h, atol=1e-5)

    # --- probs over a full sequence too (exercise masked softmax path) ---
    seq_probs, _ = rnn_forward_sequence(kparams, token_seq, hidden_state, return_probs=True)
    ref_seq_probs, _ = _reference_sequence(params, token_seq, hidden_state, return_probs=True)
    jax.block_until_ready(seq_probs)
    assert jnp.allclose(seq_probs, ref_seq_probs, atol=1e-3)

    # --- sampling-shaped call: num_sequences == 1 ---
    h1 = jnp.zeros((1, hidden_size, 1), jnp.float32)
    in1 = jnp.array([[[3]]], dtype=jnp.int32)     # (1, 1, 1)
    l1, hn1 = rnn_forward(kparams, in1, h1, return_probs=True)
    jax.block_until_ready((l1, hn1))
    ref_l1, ref_hn1 = _reference_step(params, jnp.array([3]), h1, return_probs=True)
    assert l1.shape == (1, vocab_size, 1) and hn1.shape == (1, hidden_size, 1)
    assert jnp.allclose(l1, ref_l1, atol=1e-3)
    assert jnp.allclose(hn1, ref_hn1, atol=1e-5)

    print("KERNEL_OK")
</pallas_src>

<mosaic_0001>
module attributes {stable_mosaic.version = 11 : i64} {
  func.func @_recurrence_kernel(%arg0: i32, %arg1: memref<1x8x128xf32, #tpu.memory_space<vmem>>, %arg2: memref<8x128xf32, #tpu.memory_space<vmem>>, %arg3: memref<128x128xf32, #tpu.memory_space<vmem>>, %arg4: memref<1x8x128xf32, #tpu.memory_space<vmem>>, %arg5: memref<8x128xf32, #tpu.memory_space<vmem>>) attributes {dimension_semantics = [#tpu.dimension_semantics<arbitrary>], iteration_bounds = array<i64: 1>, scalar_prefetch = 0 : i64, scratch_operands = 1 : i64, tpu.core_type = #tpu.core_type<tc>, window_params = [{transform_indices = @transform_0, window_bounds = array<i64: 1, 8, 128>}, {pipeline_mode = #tpu.pipeline_mode<synchronous>, transform_indices = @transform_1, window_bounds = array<i64: 8, 128>}, {pipeline_mode = #tpu.pipeline_mode<synchronous>, transform_indices = @transform_2, window_bounds = array<i64: 128, 128>}, {transform_indices = @transform_3, window_bounds = array<i64: 1, 8, 128>}]} {
    %c0_i32 = arith.constant 0 : i32
    %0 = arith.cmpi eq, %arg0, %c0_i32 : i32
    %1 = arith.extui %0 : i1 to i32
    %c0_i32_0 = arith.constant 0 : i32
    %2 = arith.cmpi ne, %1, %c0_i32_0 : i32
    scf.if %2 {
      %c0_11 = arith.constant 0 : index
      %c0_12 = arith.constant 0 : index
      %16 = vector.load %arg2[%c0_11, %c0_12] : memref<8x128xf32, #tpu.memory_space<vmem>>, vector<8x128xf32>
      %c0_13 = arith.constant 0 : index
      %c0_14 = arith.constant 0 : index
      %17 = vector.load %arg5[%c0_13, %c0_14] : memref<8x128xf32, #tpu.memory_space<vmem>>, vector<8x128xf32>
      tpu.vector_store %arg5[%c0_13, %c0_14], %16 {strides = array<i32>} : memref<8x128xf32, #tpu.memory_space<vmem>>, vector<8x128xf32>,
    } else {
    }
    %c0 = arith.constant 0 : index
    %c0_1 = arith.constant 0 : index
    %3 = vector.load %arg3[%c0, %c0_1] : memref<128x128xf32, #tpu.memory_space<vmem>>, vector<128x128xf32>
    %c0_2 = arith.constant 0 : index
    %c0_3 = arith.constant 0 : index
    %4 = vector.load %arg5[%c0_2, %c0_3] : memref<8x128xf32, #tpu.memory_space<vmem>>, vector<8x128xf32>
    %c0_i32_4 = arith.constant 0 : i32
    %5 = arith.index_cast %c0_i32_4 : i32 to index
    %c0_5 = arith.constant 0 : index
    %c0_6 = arith.constant 0 : index
    %6 = vector.load %arg1[%5, %c0_5, %c0_6] : memref<1x8x128xf32, #tpu.memory_space<vmem>>, vector<1x8x128xf32>
    %7 = vector.shape_cast %6 : vector<1x8x128xf32> to vector<8x128xf32>
    %cst = arith.constant dense<0.000000e+00> : vector<8x128xf32>
    %8 = tpu.matmul %4, %3, %cst {dimension_numbers = #tpu.dot_dimension_numbers<[1], [0], [0], [1], [0, 0, 1, 1], [], []>} : vector<8x128xf32>, vector<128x128xf32>, vector<8x128xf32> -> vector<8x128xf32>
    %9 = arith.addf %7, %8 : vector<8x128xf32>
    %10 = math.tanh %9 : vector<8x128xf32>
    %11 = arith.index_cast %c0_i32_4 : i32 to index
    %c0_7 = arith.constant 0 : index
    %c0_8 = arith.constant 0 : index
    %12 = vector.load %arg4[%11, %c0_7, %c0_8] : memref<1x8x128xf32, #tpu.memory_space<vmem>>, vector<1x8x128xf32>
    %13 = vector.shape_cast %12 : vector<1x8x128xf32> to vector<8x128xf32>
    %14 = vector.shape_cast %10 : vector<8x128xf32> to vector<1x8x128xf32>
    tpu.vector_store %arg4[%11, %c0_7, %c0_8], %14 {strides = array<i32>} : memref<1x8x128xf32, #tpu.memory_space<vmem>>, vector<1x8x128xf32>,
    %c1_i32 = arith.constant 1 : i32
    %c0_9 = arith.constant 0 : index
    %c0_10 = arith.constant 0 : index
    %15 = vector.load %arg5[%c0_9, %c0_10] : memref<8x128xf32, #tpu.memory_space<vmem>>, vector<8x128xf32>
    tpu.vector_store %arg5[%c0_9, %c0_10], %10 {strides = array<i32>} : memref<8x128xf32, #tpu.memory_space<vmem>>, vector<8x128xf32>,
    return
  }
  func.func @transform_0(%arg0: i32) -> (i32, i32, i32) {
    %c0_i32 = arith.constant 0 : i32
    %c0_i32_0 = arith.constant 0 : i32
    %c0_i32_1 = arith.constant 0 : i32
    return %arg0, %c0_i32, %c0_i32_0 : i32, i32, i32
  }
  func.func @transform_1(%arg0: i32) -> (i32, i32) {
    %c0_i32 = arith.constant 0 : i32
    %c0_i32_0 = arith.constant 0 : i32
    %c0_i32_1 = arith.constant 0 : i32
    return %c0_i32, %c0_i32_0 : i32, i32
  }
  func.func @transform_2(%arg0: i32) -> (i32, i32) {
    %c0_i32 = arith.constant 0 : i32
    %c0_i32_0 = arith.constant 0 : i32
    %c0_i32_1 = arith.constant 0 : i32
    return %c0_i32, %c0_i32_0 : i32, i32
  }
  func.func @transform_3(%arg0: i32) -> (i32, i32, i32) {
    %c0_i32 = arith.constant 0 : i32
    %c0_i32_0 = arith.constant 0 : i32
    %c0_i32_1 = arith.constant 0 : i32
    return %arg0, %c0_i32, %c0_i32_0 : i32, i32, i32
  }
}

</mosaic_0001>

<bundles_post_ra>
// kernel: tpu_custom_call.1
= control target key start
LH: loop header
LB: loop body
LE: loop exit
PB: predicated region body
PF: predicated region fallthrough
CT: control target
= control target key end

     0   :  { %8 = vsyncpa [#allocation4], 0  ;;  %s354_s0 = inlined_call_operand.hbm [shape: f32[1,8,128], index: 0, kind: input, shape index: {}]   ;;  %s355_s1 = inlined_call_operand.hbm [shape: f32[8,128], index: 1, kind: input, shape index: {}]   ;;  %s356_s2 = inlined_call_operand.hbm [shape: f32[128,128], index: 2, kind: input, shape index: {}]   ;;  %s357_s3 = inlined_call_operand.hbm [shape: f32[1,8,128], index: 3, kind: output, shape index: {}]  }
   0x1   :  { %9 = vsyncpa [#allocation7], 0 }
   0x2   :  { %10 = vsyncpa [#allocation5], 0  ;;  %s314_s12 = smov [#allocation6]   ;;  %s315_s14 = smov [#allocation3]  }
   0x3   :  { %s27_s13 = sshll.u32 %s314_s12, 4  ;;  %s17_s15 = sshll.u32 %s315_s14, 4  ;;  %s28_s13 = int_to_ptr.vmem [resolvable:$true] %s27_s13  ;;  %s18_s15 = int_to_ptr.vmem [resolvable:$true] %s17_s15 }
   0x4   :  { %s236_s16 = scalar_lea.vmem %s28_s13, 128  ;;  %p241_p1 = scmp.lt.s32.totalorder %s28_s13, %s28_s13 }
   0x5   :  { %p237_p0 = scmp.ne.s32.totalorder %s28_s13, %s236_s16  ;;  %p242_p2 = scmp.lt.s32.totalorder %s236_s16, %s236_s16 }
   0x7   :  { %p243_p3 = por %p242_p2, %p241_p1 }
   0x9   :  { %p244_p4 = pnand %p243_p3, %p237_p0 }
   0xb   :  { %247 = shalt.err (!%p244_p4)
}
   0xc   :  { %30 = dma.hbm_to_vmem [thread:$0]  %s355_s1, 128, %s28_s13, [#allocation7]  }
   0xd   :  { %s256_s19 = scalar_lea.vmem %s18_s15, 128  ;;  %p261_p6 = scmp.lt.s32.totalorder %s18_s15, %s18_s15 }
   0xe   :  { %p257_p5 = scmp.ne.s32.totalorder %s18_s15, %s256_s19  ;;  %p262_p7 = scmp.lt.s32.totalorder %s256_s19, %s256_s19 }
  0x10   :  { %p263_p8 = por %p262_p7, %p261_p6 }
  0x12   :  { %p264_p9 = pnand %p263_p8, %p257_p5 }
  0x14   :  { %267 = shalt.err (!%p264_p9)
}
  0x15   :  { %20 = dma.hbm_to_vmem [thread:$0]  %s354_s0, 128, %s18_s15, [#allocation4]  }
  0x16   :  { %s316_s22 = smov [#allocation8]  }
  0x17   :  { %s36_s23 = sshll.u32 %s316_s22, 4  ;;  %s37_s23 = int_to_ptr.vmem [resolvable:$true] %s36_s23 }
  0x18   :  { %s276_s24 = scalar_lea.vmem %s37_s23, 2048  ;;  %p281_p11 = scmp.lt.s32.totalorder %s37_s23, %s37_s23 }
  0x19   :  { %p277_p10 = scmp.ne.s32.totalorder %s37_s23, %s276_s24  ;;  %p282_p12 = scmp.lt.s32.totalorder %s276_s24, %s276_s24 }
  0x1b   :  { %p283_p13 = por %p282_p12, %p281_p11 }
  0x1d   :  { %p284_p0 = pnand %p283_p13, %p277_p10 }
  0x1f   :  { %287 = shalt.err (!%p284_p0)
}
  0x20   :  { %s317_s1 = smov 128   ;;  %s318_s25 = smov 8  }
  0x21   :  { %42 = dma.hbm_to_vmem [thread:$0]  %s356_s2, 2048, %s37_s23, [#allocation7], %s317_s1, %s317_s1, %s318_s25  }
  0x22   :  { %308 = dma.done.wait [#allocation4], 128  }
  0x23   :  { %309 = vsyncadd [#allocation4], 4294967168 }
  0x24   :  { %310 = dma.done.wait [#allocation7], 2176  }
  0x25   :  { %311 = vsyncadd [#allocation7], 4294965120  ;;  %v319_v0 = vmov 0.0   ;;  %vm320_vm0 = vmmov 0   ;;  %v73_v1 = vld [vmem:[#allocation8 + $0x78] sm:$0xff]  ;;  %v72_v2 = vld [vmem:[#allocation8 + $0x70] sm:$0xff] }
  0x26   :  { %183 = vmatprep.subr.mxu0 %v319_v0  ;;  %215 = vmatprep.mubr.msk.f32.mxu0 %vm320_vm0, %v319_v0  ;;  %v71_v3 = vld [vmem:[#allocation8 + $0x68] sm:$0xff]  ;;  %v70_v4 = vld [vmem:[#allocation8 + $0x60] sm:$0xff]  ;;  %v69_v5 = vld [vmem:[#allocation8 + $0x58] sm:$0xff]  ;;  %s321_s0 = smov [#allocation9]  }
  0x27   :  { %184 = vmatpush3.msra.mxu0 %v73_v1  ;;  %v68_v6 = vld [vmem:[#allocation8 + $0x50] sm:$0xff]  ;;  %v67_v7 = vld [vmem:[#allocation8 + $0x48] sm:$0xff]  ;;  %v66_v8 = vld [vmem:[#allocation8 + $0x40] sm:$0xff]  ;;  %s156_s2 = sshll.u32 %s321_s0, 4  ;;  %s157_s2 = int_to_ptr.vmem [resolvable:$true] %s156_s2 }
  0x28   :  { %185 = vmatprep.subr.mxu0 %v319_v0  ;;  %v65_v9 = vld [vmem:[#allocation8 + $0x38] sm:$0xff]  ;;  %v64_v10 = vld [vmem:[#allocation8 + $0x30] sm:$0xff]  ;;  %v63_v11 = vld [vmem:[#allocation8 + $0x28] sm:$0xff]  ;;  %s288_s28 = scalar_lea.vmem %s157_s2, 128  ;;  %p293_p2 = scmp.lt.s32.totalorder %s157_s2, %s157_s2 }
  0x29   :  { %186 = vmatpush3.msra.mxu0 %v72_v2  ;;  %v62_v12 = vld [vmem:[#allocation8 + $0x20] sm:$0xff]  ;;  %v61_v13 = vld [vmem:[#allocation8 + $0x18] sm:$0xff]  ;;  %v60_v14 = vld [vmem:[#allocation8 + $0x10] sm:$0xff]  ;;  %p289_p1 = scmp.ne.s32.totalorder %s157_s2, %s288_s28  ;;  %p294_p3 = scmp.lt.s32.totalorder %s288_s28, %s288_s28 }
  0x2a   :  { %187 = vmatprep.subr.mxu0 %v319_v0  ;;  %v59_v15 = vld [vmem:[#allocation8 + $0x8] sm:$0xff]  ;;  %v58_v16 = vld [vmem:[#allocation8] sm:$0xff]  ;;  %v56_v17 = vld [vmem:[#allocation6] sm:$0xff] }
  0x2b   :  { %188 = vmatpush3.msra.mxu0 %v71_v3  ;;  %v75_v18 = vld [vmem:[#allocation3] sm:$0xff]  ;;  %p295_p4 = por %p294_p3, %p293_p2 }
  0x2c   :  { %189 = vmatprep.subr.mxu0 %v319_v0 }
  0x2d   :  { %190 = vmatpush3.msra.mxu0 %v70_v4  ;;  %p296_p5 = pnand %p295_p4, %p289_p1 }
  0x2e   :  { %191 = vmatprep.subr.mxu0 %v319_v0 }
  0x2f   :  { %192 = vmatpush3.msra.mxu0 %v69_v5 }
  0x30   :  { %193 = vmatprep.subr.mxu0 %v319_v0 }
  0x31   :  { %194 = vmatpush3.msra.mxu0 %v68_v6 }
  0x32   :  { %195 = vmatprep.subr.mxu0 %v319_v0 }
  0x33   :  { %196 = vmatpush3.msra.mxu0 %v67_v7 }
  0x34   :  { %197 = vmatprep.subr.mxu0 %v319_v0 }
  0x35   :  { %198 = vmatpush3.msra.mxu0 %v66_v8 }
  0x36   :  { %199 = vmatprep.subr.mxu0 %v319_v0 }
  0x37   :  { %200 = vmatpush3.msra.mxu0 %v65_v9 }
  0x38   :  { %201 = vmatprep.subr.mxu0 %v319_v0 }
  0x39   :  { %202 = vmatpush3.msra.mxu0 %v64_v10 }
  0x3a   :  { %203 = vmatprep.subr.mxu0 %v319_v0 }
  0x3b   :  { %204 = vmatpush3.msra.mxu0 %v63_v11 }
  0x3c   :  { %205 = vmatprep.subr.mxu0 %v319_v0 }
  0x3d   :  { %206 = vmatpush3.msra.mxu0 %v62_v12 }
  0x3e   :  { %207 = vmatprep.subr.mxu0 %v319_v0 }
  0x3f   :  { %208 = vmatpush3.msra.mxu0 %v61_v13 }
  0x40   :  { %209 = vmatprep.subr.mxu0 %v319_v0 }
  0x41   :  { %210 = vmatpush3.msra.mxu0 %v60_v14 }
  0x42   :  { %211 = vmatprep.subr.mxu0 %v319_v0 }
  0x43   :  { %212 = vmatpush3.msra.mxu0 %v59_v15 }
  0x44   :  { %213 = vmatprep.subr.mxu0 %v319_v0 }
  0x45   :  { %214 = vmatpush3.msra.mxu0 %v58_v16 }
  0x46   :  { %216 = vmatmul.mubr.f32.vlgmr.msra.gmra.mxu0 %v56_v17 }
 0x106   :  { %v142_v19 = vpop.f32.mrf.mxu0 }
 0x107   :  { %v146_v20 = vadd.f32 %v142_v19, %v75_v18 }
 0x108   :  { %v217_v21 = vpop.f32.mrf.mxu0 }
 0x109   :  { %226 = vtanh.f32 %v146_v20 }
 0x116   :  { %v227_v22 = vpop.eup %226 }
 0x117   :  { %148 = vst [vmem:[#allocation9] sm:$0xff] %v227_v22 }
 0x118   :  { %299 = shalt.err (!%p296_p5)
}
 0x119   :  { %159 = dma.vmem_to_hbm [thread:$0]  %s157_s2, 128, %s357_s3, [#allocation5]  }
 0x11a   :  { %312 = dma.done.wait [#allocation5], 128  }
 0x11b   :  { %313 = vsyncadd [#allocation5], 4294967168 }
 0x11c   :  { %163 = vsyncpa [#allocation4], 1 }
 0x11d   :  { %164 = vsyncpa [#allocation7], 1 }
 0x11e   :  { %165 = vsyncpa [#allocation5], 1 }

</bundles_post_ra>
